<compile_context>
chip_gen: v5e
topology: v5e:2x2
jax: 0.10.0
libtpu: 0.0.40
codegen_flags: <defaults>
</compile_context>

<pallas_src>
import jax
import jax.numpy as jnp
from jax import lax
from jax.experimental import pallas as pl
from jax.experimental.pallas import tpu as pltpu


def encoder_kernel(tok_ref,    # VMEM (T*Bp, 1)  int32  time-major token ids
                   lenm_ref,   # VMEM (Bp, H)    int32  per-row lengths (bcast over H)
                   embw_ref,   # VMEM (VP, 4H)   f32    Emb @ W_ih^T (vocab zero-padded, g-cols x2)
                   whh_ref,    # VMEM (H, 4H)    f32    W_hh^T (g-cols x2)
                   b_ref,      # VMEM (1, 4H)    f32    b_ih + b_hh (g-cols x2)
                   w1_ref,     # VMEM (H, HM)    f32    W1^T lane-padded to 128
                   b1_ref,     # VMEM (1, HM)
                   w2_ref,     # VMEM (HM, TAGP) f32    W2^T zero-padded rows/cols
                   b2_ref,     # VMEM (1, TAGP)
                   out_ref):   # VMEM (Bp, TAGP)
    Bp, H = lenm_ref.shape
    TB = tok_ref.shape[0]
    T = TB // Bp
    VP = embw_ref.shape[0]

    # ---- Fused embedding lookup + input projection (one MXU call, all T). ---
    vocab_iota = lax.broadcasted_iota(jnp.int32, (TB, VP), 1)
    one_hot = (vocab_iota == tok_ref[...]).astype(jnp.float32)        # (TB, VP)
    xw = (jnp.dot(one_hot, embw_ref[...], preferred_element_type=jnp.float32)
          + b_ref[...])                                               # (TB, 4H)

    len_bh = lenm_ref[...]                                            # (Bp, H)

    # ---- LSTM recurrence, fully unrolled (T small & static). ----------------
    # TODO(synk): pltpu.matmul_push_rhs/acc_lhs/pop could pin W_hh in the MXU
    # weight registers across the T serial steps; kept as jnp.dot for lowering
    # robustness at these tiny shapes.
    h = jnp.zeros((Bp, H), jnp.float32)
    c = jnp.zeros((Bp, H), jnp.float32)
    pool = jnp.full((Bp, H), -jnp.inf, jnp.float32)
    for t in range(T):
        gates = (xw[t * Bp:(t + 1) * Bp, :]
                 + jnp.dot(h, whh_ref[...], preferred_element_type=jnp.float32))
        # Single full-width EUP pass; g-gate columns were pre-scaled by 2 so the
        # tanh gate is recovered as 2*sigmoid(2x) - 1 with a free VPU affine.
        sig = jax.nn.sigmoid(gates)                                   # (Bp, 4H)
        i_g = sig[:, 0 * H:1 * H]
        f_g = sig[:, 1 * H:2 * H]
        g_g = 2.0 * sig[:, 2 * H:3 * H] - 1.0
        o_g = sig[:, 3 * H:4 * H]
        c = f_g * c + i_g * g_g
        h = o_g * jnp.tanh(c)
        # pack/pad_packed semantics: outputs past each row's length are zero,
        # and those zeros participate in the max pool.
        pool = jnp.maximum(pool, jnp.where(len_bh > t, h, 0.0))

    # ---- MLP head: ReLU -> Linear -> ReLU -> (Dropout==id) -> Linear. -------
    # TODO(synk): nn.Dropout() modeled as identity (deterministic / eval mode).
    v = jnp.maximum(pool, 0.0)
    v1 = jnp.maximum(
        jnp.dot(v, w1_ref[...], preferred_element_type=jnp.float32) + b1_ref[...],
        0.0)
    out_ref[...] = (jnp.dot(v1, w2_ref[...], preferred_element_type=jnp.float32)
                    + b2_ref[...])


def encoder_forward(token_ids, lengths, emb, w_ih, w_hh, b_ih, b_hh,
                    w1, b1, w2, b2, *, tagset_size):
    """token_ids: (B, T) int32; lengths: (B,) int32 (descending, pack order)."""
    B, T = token_ids.shape
    vocab, E = emb.shape
    H = w_hh.shape[1]
    assert w_ih.shape == (4 * H, E) and w_hh.shape == (4 * H, H)

    BP = 8        # batch padded to one full sublane group
    VP = 128      # lane-dense one-hot / vocab padding
    HM = 128      # lane-dense MLP hidden width (real width H // 4)
    TAGP = 128    # lane-dense head output width
    HQ = H // 4
    assert B <= BP and vocab <= VP and HQ <= HM and tagset_size <= TAGP

    # ---- Batch padding (rows B..BP-1: padding token id 1, length 0). --------
    tok_pad = jnp.full((BP, T), 1, jnp.int32).at[:B, :].set(token_ids.astype(jnp.int32))
    len_pad = jnp.zeros((BP,), jnp.int32).at[:B].set(lengths.astype(jnp.int32))

    tok_tm = jnp.transpose(tok_pad).reshape(T * BP, 1)        # time-major ids
    assert tok_tm.shape[0] % BP == 0
    lenm = jnp.broadcast_to(len_pad[:, None], (BP, H)).astype(jnp.int32)

    # ---- Parameter prep (done once): fuse embedding, scale g-gate cols by 2,
    # ---- lane-pad the MLP hidden width and the head output. -----------------
    gscale = jnp.ones((4 * H,), jnp.float32).at[2 * H:3 * H].set(2.0)
    wih_t = jnp.transpose(w_ih) * gscale[None, :]                         # (E, 4H)
    embw = jnp.zeros((VP, 4 * H), jnp.float32).at[:vocab, :].set(emb @ wih_t)
    whh_t = jnp.transpose(w_hh) * gscale[None, :]                         # (H, 4H)
    bias = ((b_ih + b_hh) * gscale)[None, :]                              # (1, 4H)
    w1_t = jnp.zeros((H, HM), jnp.float32).at[:, :HQ].set(jnp.transpose(w1))
    b1_p = jnp.zeros((1, HM), jnp.float32).at[:, :HQ].set(b1[None, :])
    w2_t = jnp.zeros((HM, TAGP), jnp.float32).at[:HQ, :tagset_size].set(jnp.transpose(w2))
    b2_p = jnp.zeros((1, TAGP), jnp.float32).at[:, :tagset_size].set(b2[None, :])

    operands = (tok_tm, lenm, embw, whh_t, bias, w1_t, b1_p, w2_t, b2_p)

    def full(shape):
        return pl.BlockSpec(shape, lambda i, _s=shape: (0,) * len(_s))

    flops = (2 * T * BP * VP * 4 * H            # fused embedding/input projection
             + T * 2 * BP * H * 4 * H           # recurrent matmuls
             + 2 * BP * H * HM                  # MLP layer 1
             + 2 * BP * HM * TAGP)              # MLP layer 2
    transcendentals = T * BP * (4 * H + H)      # sigmoid pass + tanh(c) per step
    bytes_accessed = (sum(int(a.size) * a.dtype.itemsize for a in operands)
                      + BP * TAGP * 4)

    out = pl.pallas_call(
        encoder_kernel,
        out_shape=jax.ShapeDtypeStruct((BP, TAGP), jnp.float32),
        grid=(1,),
        in_specs=[full(a.shape) for a in operands],
        out_specs=full((BP, TAGP)),
        compiler_params=pltpu.CompilerParams(dimension_semantics=("arbitrary",)),
        cost_estimate=pl.CostEstimate(flops=flops,
                                      transcendentals=transcendentals,
                                      bytes_accessed=bytes_accessed),
    )(*operands)
    return out[:B, :tagset_size]


if __name__ == "__main__":
    # Small shapes consistent with the module defaults.
    VOCAB, E, H, TAG = 20, 16, 32, 50
    B, T = 4, 8

    key = jax.random.PRNGKey(0)
    ks = jax.random.split(key, 10)

    # Deterministic "parameters" (synthetic init, not a checkpoint).
    emb = jax.random.normal(ks[0], (VOCAB, E), jnp.float32) * 0.1
    emb = emb.at[1].set(0.0)                     # padding_idx=1 row is zero
    w_ih = jax.random.normal(ks[1], (4 * H, E), jnp.float32) * 0.1
    w_hh = jax.random.normal(ks[2], (4 * H, H), jnp.float32) * 0.1
    b_ih = jax.random.normal(ks[3], (4 * H,), jnp.float32) * 0.1
    b_hh = jax.random.normal(ks[4], (4 * H,), jnp.float32) * 0.1
    w1 = jax.random.normal(ks[5], (H // 4, H), jnp.float32) * 0.1
    b1 = jax.random.normal(ks[6], (H // 4,), jnp.float32) * 0.1
    w2 = jax.random.normal(ks[7], (TAG, H // 4), jnp.float32) * 0.1
    b2 = jax.random.normal(ks[8], (TAG,), jnp.float32) * 0.1

    # Inputs: token ids (B, T) and sorted-descending lengths
    # (pack_padded_sequence default enforce_sorted=True).
    s_length = jnp.array([8, 6, 5, 3], dtype=jnp.int32)
    s = jax.random.randint(ks[9], (B, T), 2, VOCAB, dtype=jnp.int32)
    pad_mask = jnp.arange(T)[None, :] >= s_length[:, None]
    s = jnp.where(pad_mask, 1, s)                # pad positions -> padding_idx

    out = encoder_forward(s, s_length, emb, w_ih, w_hh, b_ih, b_hh,
                          w1, b1, w2, b2, tagset_size=TAG)
    jax.block_until_ready(out)

    # Pure-JAX reference with original (unfused, unpadded) parameters:
    # packed LSTM + masked max pool + MLP head.
    def reference(tok, lens):
        x_tbe = jnp.transpose(emb[tok], (1, 0, 2))          # (T, B, E)
        h = jnp.zeros((B, H), jnp.float32)
        c = jnp.zeros((B, H), jnp.float32)
        pooled = jnp.full((B, H), -jnp.inf, jnp.float32)
        for t in range(T):
            g = x_tbe[t] @ w_ih.T + b_ih + h @ w_hh.T + b_hh
            i = jax.nn.sigmoid(g[:, :H])
            f = jax.nn.sigmoid(g[:, H:2 * H])
            gg = jnp.tanh(g[:, 2 * H:3 * H])
            o = jax.nn.sigmoid(g[:, 3 * H:4 * H])
            c = f * c + i * gg
            h = o * jnp.tanh(c)
            pooled = jnp.maximum(pooled, jnp.where((lens > t)[:, None], h, 0.0))
        v = jnp.maximum(pooled, 0.0)
        v1 = jnp.maximum(v @ w1.T + b1, 0.0)
        return v1 @ w2.T + b2

    ref = reference(s, s_length)
    assert out.shape == (B, TAG) and out.dtype == jnp.float32
    assert bool(jnp.allclose(out, ref, atol=1e-4, rtol=1e-4)), "mismatch vs reference"
    print("KERNEL_OK")
</pallas_src>

<mosaic_0001>
module attributes {stable_mosaic.version = 11 : i64} {
  func.func @encoder_kernel(%arg0: i32, %arg1: memref<64x1xi32, #tpu.memory_space<vmem>>, %arg2: memref<8x32xi32, #tpu.memory_space<vmem>>, %arg3: memref<128x128xf32, #tpu.memory_space<vmem>>, %arg4: memref<32x128xf32, #tpu.memory_space<vmem>>, %arg5: memref<1x128xf32, #tpu.memory_space<vmem>>, %arg6: memref<32x128xf32, #tpu.memory_space<vmem>>, %arg7: memref<1x128xf32, #tpu.memory_space<vmem>>, %arg8: memref<128x128xf32, #tpu.memory_space<vmem>>, %arg9: memref<1x128xf32, #tpu.memory_space<vmem>>, %arg10: memref<8x128xf32, #tpu.memory_space<vmem>>) attributes {dimension_semantics = [#tpu.dimension_semantics<arbitrary>], iteration_bounds = array<i64: 1>, scalar_prefetch = 0 : i64, scratch_operands = 0 : i64, tpu.core_type = #tpu.core_type<tc>, window_params = [{pipeline_mode = #tpu.pipeline_mode<synchronous>, transform_indices = @transform_0, window_bounds = array<i64: 64, 1>}, {pipeline_mode = #tpu.pipeline_mode<synchronous>, transform_indices = @transform_1, window_bounds = array<i64: 8, 32>}, {pipeline_mode = #tpu.pipeline_mode<synchronous>, transform_indices = @transform_2, window_bounds = array<i64: 128, 128>}, {pipeline_mode = #tpu.pipeline_mode<synchronous>, transform_indices = @transform_3, window_bounds = array<i64: 32, 128>}, {pipeline_mode = #tpu.pipeline_mode<synchronous>, transform_indices = @transform_4, window_bounds = array<i64: 1, 128>}, {pipeline_mode = #tpu.pipeline_mode<synchronous>, transform_indices = @transform_5, window_bounds = array<i64: 32, 128>}, {pipeline_mode = #tpu.pipeline_mode<synchronous>, transform_indices = @transform_6, window_bounds = array<i64: 1, 128>}, {pipeline_mode = #tpu.pipeline_mode<synchronous>, transform_indices = @transform_7, window_bounds = array<i64: 128, 128>}, {pipeline_mode = #tpu.pipeline_mode<synchronous>, transform_indices = @transform_8, window_bounds = array<i64: 1, 128>}, {pipeline_mode = #tpu.pipeline_mode<synchronous>, transform_indices = @transform_9, window_bounds = array<i64: 8, 128>}]} {
    %0 = tpu.iota {dimensions = array<i32: 1>} : vector<64x128xi32>
    %c0 = arith.constant 0 : index
    %c0_0 = arith.constant 0 : index
    %1 = vector.load %arg1[%c0, %c0_0] : memref<64x1xi32, #tpu.memory_space<vmem>>, vector<64x1xi32>
    %2 = vector.broadcast %1 : vector<64x1xi32> to vector<64x128xi32>
    %3 = arith.cmpi eq, %0, %2 : vector<64x128xi32>
    %4 = arith.extui %3 : vector<64x128xi1> to vector<64x128xi32>
    %5 = arith.sitofp %4 : vector<64x128xi32> to vector<64x128xf32>
    %c0_1 = arith.constant 0 : index
    %c0_2 = arith.constant 0 : index
    %6 = vector.load %arg3[%c0_1, %c0_2] : memref<128x128xf32, #tpu.memory_space<vmem>>, vector<128x128xf32>
    %cst = arith.constant dense<0.000000e+00> : vector<64x128xf32>
    %7 = tpu.matmul %5, %6, %cst {dimension_numbers = #tpu.dot_dimension_numbers<[1], [0], [0], [1], [0, 0, 1, 1], [], []>} : vector<64x128xf32>, vector<128x128xf32>, vector<64x128xf32> -> vector<64x128xf32>
    %c0_3 = arith.constant 0 : index
    %c0_4 = arith.constant 0 : index
    %8 = vector.load %arg5[%c0_3, %c0_4] : memref<1x128xf32, #tpu.memory_space<vmem>>, vector<1x128xf32>
    %9 = vector.broadcast %8 : vector<1x128xf32> to vector<64x128xf32>
    %10 = arith.addf %7, %9 : vector<64x128xf32>
    %c0_5 = arith.constant 0 : index
    %c0_6 = arith.constant 0 : index
    %11 = vector.load %arg2[%c0_5, %c0_6] : memref<8x32xi32, #tpu.memory_space<vmem>>, vector<8x32xi32>
    %cst_7 = arith.constant 0.000000e+00 : f32
    %12 = vector.broadcast %cst_7 : f32 to vector<8x32xf32>
    %cst_8 = arith.constant 0.000000e+00 : f32
    %13 = vector.broadcast %cst_8 : f32 to vector<8x32xf32>
    %cst_9 = arith.constant 0xFF800000 : f32
    %14 = vector.broadcast %cst_9 : f32 to vector<8x32xf32>
    %15 = vector.extract_strided_slice %10 {offsets = [0, 0], sizes = [8, 128], strides = [1, 1]} : vector<64x128xf32> to vector<8x128xf32>
    %c0_10 = arith.constant 0 : index
    %c0_11 = arith.constant 0 : index
    %16 = vector.load %arg4[%c0_10, %c0_11] : memref<32x128xf32, #tpu.memory_space<vmem>>, vector<32x128xf32>
    %cst_12 = arith.constant dense<0.000000e+00> : vector<8x128xf32>
    %17 = tpu.matmul %12, %16, %cst_12 {dimension_numbers = #tpu.dot_dimension_numbers<[1], [0], [0], [1], [0, 0, 1, 1], [], []>} : vector<8x32xf32>, vector<32x128xf32>, vector<8x128xf32> -> vector<8x128xf32>
    %18 = arith.addf %15, %17 : vector<8x128xf32>
    %19 = arith.negf %18 : vector<8x128xf32>
    %20 = math.exp %19 : vector<8x128xf32>
    %cst_13 = arith.constant 1.000000e+00 : f32
    %21 = vector.broadcast %cst_13 : f32 to vector<8x128xf32>
    %22 = arith.addf %21, %20 : vector<8x128xf32>
    %23 = arith.divf %21, %22 : vector<8x128xf32>
    %24 = vector.extract_strided_slice %23 {offsets = [0, 0], sizes = [8, 32], strides = [1, 1]} : vector<8x128xf32> to vector<8x32xf32>
    %25 = vector.extract_strided_slice %23 {offsets = [0, 32], sizes = [8, 32], strides = [1, 1]} : vector<8x128xf32> to vector<8x32xf32>
    %26 = vector.extract_strided_slice %23 {offsets = [0, 64], sizes = [8, 32], strides = [1, 1]} : vector<8x128xf32> to vector<8x32xf32>
    %cst_14 = arith.constant 2.000000e+00 : f32
    %27 = vector.broadcast %cst_14 : f32 to vector<8x32xf32>
    %28 = arith.mulf %27, %26 : vector<8x32xf32>
    %cst_15 = arith.constant 1.000000e+00 : f32
    %29 = vector.broadcast %cst_15 : f32 to vector<8x32xf32>
    %30 = arith.subf %28, %29 : vector<8x32xf32>
    %31 = vector.extract_strided_slice %23 {offsets = [0, 96], sizes = [8, 32], strides = [1, 1]} : vector<8x128xf32> to vector<8x32xf32>
    %32 = arith.mulf %25, %13 : vector<8x32xf32>
    %33 = arith.mulf %24, %30 : vector<8x32xf32>
    %34 = arith.addf %32, %33 : vector<8x32xf32>
    %35 = math.tanh %34 : vector<8x32xf32>
    %36 = arith.mulf %31, %35 : vector<8x32xf32>
    %c0_i32 = arith.constant 0 : i32
    %37 = vector.broadcast %c0_i32 : i32 to vector<8x32xi32>
    %38 = arith.cmpi sgt, %11, %37 : vector<8x32xi32>
    %cst_16 = arith.constant 0.000000e+00 : f32
    %39 = vector.broadcast %cst_16 : f32 to vector<8x32xf32>
    %40 = arith.select %38, %36, %39 : vector<8x32xi1>, vector<8x32xf32>
    %41 = arith.maximumf %14, %40 : vector<8x32xf32>
    %42 = vector.extract_strided_slice %10 {offsets = [8, 0], sizes = [8, 128], strides = [1, 1]} : vector<64x128xf32> to vector<8x128xf32>
    %c0_17 = arith.constant 0 : index
    %c0_18 = arith.constant 0 : index
    %43 = vector.load %arg4[%c0_17, %c0_18] : memref<32x128xf32, #tpu.memory_space<vmem>>, vector<32x128xf32>
    %cst_19 = arith.constant dense<0.000000e+00> : vector<8x128xf32>
    %44 = tpu.matmul %36, %43, %cst_19 {dimension_numbers = #tpu.dot_dimension_numbers<[1], [0], [0], [1], [0, 0, 1, 1], [], []>} : vector<8x32xf32>, vector<32x128xf32>, vector<8x128xf32> -> vector<8x128xf32>
    %45 = arith.addf %42, %44 : vector<8x128xf32>
    %46 = arith.negf %45 : vector<8x128xf32>
    %47 = math.exp %46 : vector<8x128xf32>
    %cst_20 = arith.constant 1.000000e+00 : f32
    %48 = vector.broadcast %cst_20 : f32 to vector<8x128xf32>
    %49 = arith.addf %48, %47 : vector<8x128xf32>
    %50 = arith.divf %48, %49 : vector<8x128xf32>
    %51 = vector.extract_strided_slice %50 {offsets = [0, 0], sizes = [8, 32], strides = [1, 1]} : vector<8x128xf32> to vector<8x32xf32>
    %52 = vector.extract_strided_slice %50 {offsets = [0, 32], sizes = [8, 32], strides = [1, 1]} : vector<8x128xf32> to vector<8x32xf32>
    %53 = vector.extract_strided_slice %50 {offsets = [0, 64], sizes = [8, 32], strides = [1, 1]} : vector<8x128xf32> to vector<8x32xf32>
    %cst_21 = arith.constant 2.000000e+00 : f32
    %54 = vector.broadcast %cst_21 : f32 to vector<8x32xf32>
    %55 = arith.mulf %54, %53 : vector<8x32xf32>
    %cst_22 = arith.constant 1.000000e+00 : f32
    %56 = vector.broadcast %cst_22 : f32 to vector<8x32xf32>
    %57 = arith.subf %55, %56 : vector<8x32xf32>
    %58 = vector.extract_strided_slice %50 {offsets = [0, 96], sizes = [8, 32], strides = [1, 1]} : vector<8x128xf32> to vector<8x32xf32>
    %59 = arith.mulf %52, %34 : vector<8x32xf32>
    %60 = arith.mulf %51, %57 : vector<8x32xf32>
    %61 = arith.addf %59, %60 : vector<8x32xf32>
    %62 = math.tanh %61 : vector<8x32xf32>
    %63 = arith.mulf %58, %62 : vector<8x32xf32>
    %c1_i32 = arith.constant 1 : i32
    %64 = vector.broadcast %c1_i32 : i32 to vector<8x32xi32>
    %65 = arith.cmpi sgt, %11, %64 : vector<8x32xi32>
    %cst_23 = arith.constant 0.000000e+00 : f32
    %66 = vector.broadcast %cst_23 : f32 to vector<8x32xf32>
    %67 = arith.select %65, %63, %66 : vector<8x32xi1>, vector<8x32xf32>
    %68 = arith.maximumf %41, %67 : vector<8x32xf32>
    %69 = vector.extract_strided_slice %10 {offsets = [16, 0], sizes = [8, 128], strides = [1, 1]} : vector<64x128xf32> to vector<8x128xf32>
    %c0_24 = arith.constant 0 : index
    %c0_25 = arith.constant 0 : index
    %70 = vector.load %arg4[%c0_24, %c0_25] : memref<32x128xf32, #tpu.memory_space<vmem>>, vector<32x128xf32>
    %cst_26 = arith.constant dense<0.000000e+00> : vector<8x128xf32>
    %71 = tpu.matmul %63, %70, %cst_26 {dimension_numbers = #tpu.dot_dimension_numbers<[1], [0], [0], [1], [0, 0, 1, 1], [], []>} : vector<8x32xf32>, vector<32x128xf32>, vector<8x128xf32> -> vector<8x128xf32>
    %72 = arith.addf %69, %71 : vector<8x128xf32>
    %73 = arith.negf %72 : vector<8x128xf32>
    %74 = math.exp %73 : vector<8x128xf32>
    %cst_27 = arith.constant 1.000000e+00 : f32
    %75 = vector.broadcast %cst_27 : f32 to vector<8x128xf32>
    %76 = arith.addf %75, %74 : vector<8x128xf32>
    %77 = arith.divf %75, %76 : vector<8x128xf32>
    %78 = vector.extract_strided_slice %77 {offsets = [0, 0], sizes = [8, 32], strides = [1, 1]} : vector<8x128xf32> to vector<8x32xf32>
    %79 = vector.extract_strided_slice %77 {offsets = [0, 32], sizes = [8, 32], strides = [1, 1]} : vector<8x128xf32> to vector<8x32xf32>
    %80 = vector.extract_strided_slice %77 {offsets = [0, 64], sizes = [8, 32], strides = [1, 1]} : vector<8x128xf32> to vector<8x32xf32>
    %cst_28 = arith.constant 2.000000e+00 : f32
    %81 = vector.broadcast %cst_28 : f32 to vector<8x32xf32>
    %82 = arith.mulf %81, %80 : vector<8x32xf32>
    %cst_29 = arith.constant 1.000000e+00 : f32
    %83 = vector.broadcast %cst_29 : f32 to vector<8x32xf32>
    %84 = arith.subf %82, %83 : vector<8x32xf32>
    %85 = vector.extract_strided_slice %77 {offsets = [0, 96], sizes = [8, 32], strides = [1, 1]} : vector<8x128xf32> to vector<8x32xf32>
    %86 = arith.mulf %79, %61 : vector<8x32xf32>
    %87 = arith.mulf %78, %84 : vector<8x32xf32>
    %88 = arith.addf %86, %87 : vector<8x32xf32>
    %89 = math.tanh %88 : vector<8x32xf32>
    %90 = arith.mulf %85, %89 : vector<8x32xf32>
    %c2_i32 = arith.constant 2 : i32
    %91 = vector.broadcast %c2_i32 : i32 to vector<8x32xi32>
    %92 = arith.cmpi sgt, %11, %91 : vector<8x32xi32>
    %cst_30 = arith.constant 0.000000e+00 : f32
    %93 = vector.broadcast %cst_30 : f32 to vector<8x32xf32>
    %94 = arith.select %92, %90, %93 : vector<8x32xi1>, vector<8x32xf32>
    %95 = arith.maximumf %68, %94 : vector<8x32xf32>
    %96 = vector.extract_strided_slice %10 {offsets = [24, 0], sizes = [8, 128], strides = [1, 1]} : vector<64x128xf32> to vector<8x128xf32>
    %c0_31 = arith.constant 0 : index
    %c0_32 = arith.constant 0 : index
    %97 = vector.load %arg4[%c0_31, %c0_32] : memref<32x128xf32, #tpu.memory_space<vmem>>, vector<32x128xf32>
    %cst_33 = arith.constant dense<0.000000e+00> : vector<8x128xf32>
    %98 = tpu.matmul %90, %97, %cst_33 {dimension_numbers = #tpu.dot_dimension_numbers<[1], [0], [0], [1], [0, 0, 1, 1], [], []>} : vector<8x32xf32>, vector<32x128xf32>, vector<8x128xf32> -> vector<8x128xf32>
    %99 = arith.addf %96, %98 : vector<8x128xf32>
    %100 = arith.negf %99 : vector<8x128xf32>
    %101 = math.exp %100 : vector<8x128xf32>
    %cst_34 = arith.constant 1.000000e+00 : f32
    %102 = vector.broadcast %cst_34 : f32 to vector<8x128xf32>
    %103 = arith.addf %102, %101 : vector<8x128xf32>
    %104 = arith.divf %102, %103 : vector<8x128xf32>
    %105 = vector.extract_strided_slice %104 {offsets = [0, 0], sizes = [8, 32], strides = [1, 1]} : vector<8x128xf32> to vector<8x32xf32>
    %106 = vector.extract_strided_slice %104 {offsets = [0, 32], sizes = [8, 32], strides = [1, 1]} : vector<8x128xf32> to vector<8x32xf32>
    %107 = vector.extract_strided_slice %104 {offsets = [0, 64], sizes = [8, 32], strides = [1, 1]} : vector<8x128xf32> to vector<8x32xf32>
    %cst_35 = arith.constant 2.000000e+00 : f32
    %108 = vector.broadcast %cst_35 : f32 to vector<8x32xf32>
    %109 = arith.mulf %108, %107 : vector<8x32xf32>
    %cst_36 = arith.constant 1.000000e+00 : f32
    %110 = vector.broadcast %cst_36 : f32 to vector<8x32xf32>
    %111 = arith.subf %109, %110 : vector<8x32xf32>
    %112 = vector.extract_strided_slice %104 {offsets = [0, 96], sizes = [8, 32], strides = [1, 1]} : vector<8x128xf32> to vector<8x32xf32>
    %113 = arith.mulf %106, %88 : vector<8x32xf32>
    %114 = arith.mulf %105, %111 : vector<8x32xf32>
    %115 = arith.addf %113, %114 : vector<8x32xf32>
    %116 = math.tanh %115 : vector<8x32xf32>
    %117 = arith.mulf %112, %116 : vector<8x32xf32>
    %c3_i32 = arith.constant 3 : i32
    %118 = vector.broadcast %c3_i32 : i32 to vector<8x32xi32>
    %119 = arith.cmpi sgt, %11, %118 : vector<8x32xi32>
    %cst_37 = arith.constant 0.000000e+00 : f32
    %120 = vector.broadcast %cst_37 : f32 to vector<8x32xf32>
    %121 = arith.select %119, %117, %120 : vector<8x32xi1>, vector<8x32xf32>
    %122 = arith.maximumf %95, %121 : vector<8x32xf32>
    %123 = vector.extract_strided_slice %10 {offsets = [32, 0], sizes = [8, 128], strides = [1, 1]} : vector<64x128xf32> to vector<8x128xf32>
    %c0_38 = arith.constant 0 : index
    %c0_39 = arith.constant 0 : index
    %124 = vector.load %arg4[%c0_38, %c0_39] : memref<32x128xf32, #tpu.memory_space<vmem>>, vector<32x128xf32>
    %cst_40 = arith.constant dense<0.000000e+00> : vector<8x128xf32>
    %125 = tpu.matmul %117, %124, %cst_40 {dimension_numbers = #tpu.dot_dimension_numbers<[1], [0], [0], [1], [0, 0, 1, 1], [], []>} : vector<8x32xf32>, vector<32x128xf32>, vector<8x128xf32> -> vector<8x128xf32>
    %126 = arith.addf %123, %125 : vector<8x128xf32>
    %127 = arith.negf %126 : vector<8x128xf32>
    %128 = math.exp %127 : vector<8x128xf32>
    %cst_41 = arith.constant 1.000000e+00 : f32
    %129 = vector.broadcast %cst_41 : f32 to vector<8x128xf32>
    %130 = arith.addf %129, %128 : vector<8x128xf32>
    %131 = arith.divf %129, %130 : vector<8x128xf32>
    %132 = vector.extract_strided_slice %131 {offsets = [0, 0], sizes = [8, 32], strides = [1, 1]} : vector<8x128xf32> to vector<8x32xf32>
    %133 = vector.extract_strided_slice %131 {offsets = [0, 32], sizes = [8, 32], strides = [1, 1]} : vector<8x128xf32> to vector<8x32xf32>
    %134 = vector.extract_strided_slice %131 {offsets = [0, 64], sizes = [8, 32], strides = [1, 1]} : vector<8x128xf32> to vector<8x32xf32>
    %cst_42 = arith.constant 2.000000e+00 : f32
    %135 = vector.broadcast %cst_42 : f32 to vector<8x32xf32>
    %136 = arith.mulf %135, %134 : vector<8x32xf32>
    %cst_43 = arith.constant 1.000000e+00 : f32
    %137 = vector.broadcast %cst_43 : f32 to vector<8x32xf32>
    %138 = arith.subf %136, %137 : vector<8x32xf32>
    %139 = vector.extract_strided_slice %131 {offsets = [0, 96], sizes = [8, 32], strides = [1, 1]} : vector<8x128xf32> to vector<8x32xf32>
    %140 = arith.mulf %133, %115 : vector<8x32xf32>
    %141 = arith.mulf %132, %138 : vector<8x32xf32>
    %142 = arith.addf %140, %141 : vector<8x32xf32>
    %143 = math.tanh %142 : vector<8x32xf32>
    %144 = arith.mulf %139, %143 : vector<8x32xf32>
    %c4_i32 = arith.constant 4 : i32
    %145 = vector.broadcast %c4_i32 : i32 to vector<8x32xi32>
    %146 = arith.cmpi sgt, %11, %145 : vector<8x32xi32>
    %cst_44 = arith.constant 0.000000e+00 : f32
    %147 = vector.broadcast %cst_44 : f32 to vector<8x32xf32>
    %148 = arith.select %146, %144, %147 : vector<8x32xi1>, vector<8x32xf32>
    %149 = arith.maximumf %122, %148 : vector<8x32xf32>
    %150 = vector.extract_strided_slice %10 {offsets = [40, 0], sizes = [8, 128], strides = [1, 1]} : vector<64x128xf32> to vector<8x128xf32>
    %c0_45 = arith.constant 0 : index
    %c0_46 = arith.constant 0 : index
    %151 = vector.load %arg4[%c0_45, %c0_46] : memref<32x128xf32, #tpu.memory_space<vmem>>, vector<32x128xf32>
    %cst_47 = arith.constant dense<0.000000e+00> : vector<8x128xf32>
    %152 = tpu.matmul %144, %151, %cst_47 {dimension_numbers = #tpu.dot_dimension_numbers<[1], [0], [0], [1], [0, 0, 1, 1], [], []>} : vector<8x32xf32>, vector<32x128xf32>, vector<8x128xf32> -> vector<8x128xf32>
    %153 = arith.addf %150, %152 : vector<8x128xf32>
    %154 = arith.negf %153 : vector<8x128xf32>
    %155 = math.exp %154 : vector<8x128xf32>
    %cst_48 = arith.constant 1.000000e+00 : f32
    %156 = vector.broadcast %cst_48 : f32 to vector<8x128xf32>
    %157 = arith.addf %156, %155 : vector<8x128xf32>
    %158 = arith.divf %156, %157 : vector<8x128xf32>
    %159 = vector.extract_strided_slice %158 {offsets = [0, 0], sizes = [8, 32], strides = [1, 1]} : vector<8x128xf32> to vector<8x32xf32>
    %160 = vector.extract_strided_slice %158 {offsets = [0, 32], sizes = [8, 32], strides = [1, 1]} : vector<8x128xf32> to vector<8x32xf32>
    %161 = vector.extract_strided_slice %158 {offsets = [0, 64], sizes = [8, 32], strides = [1, 1]} : vector<8x128xf32> to vector<8x32xf32>
    %cst_49 = arith.constant 2.000000e+00 : f32
    %162 = vector.broadcast %cst_49 : f32 to vector<8x32xf32>
    %163 = arith.mulf %162, %161 : vector<8x32xf32>
    %cst_50 = arith.constant 1.000000e+00 : f32
    %164 = vector.broadcast %cst_50 : f32 to vector<8x32xf32>
    %165 = arith.subf %163, %164 : vector<8x32xf32>
    %166 = vector.extract_strided_slice %158 {offsets = [0, 96], sizes = [8, 32], strides = [1, 1]} : vector<8x128xf32> to vector<8x32xf32>
    %167 = arith.mulf %160, %142 : vector<8x32xf32>
    %168 = arith.mulf %159, %165 : vector<8x32xf32>
    %169 = arith.addf %167, %168 : vector<8x32xf32>
    %170 = math.tanh %169 : vector<8x32xf32>
    %171 = arith.mulf %166, %170 : vector<8x32xf32>
    %c5_i32 = arith.constant 5 : i32
    %172 = vector.broadcast %c5_i32 : i32 to vector<8x32xi32>
    %173 = arith.cmpi sgt, %11, %172 : vector<8x32xi32>
    %cst_51 = arith.constant 0.000000e+00 : f32
    %174 = vector.broadcast %cst_51 : f32 to vector<8x32xf32>
    %175 = arith.select %173, %171, %174 : vector<8x32xi1>, vector<8x32xf32>
    %176 = arith.maximumf %149, %175 : vector<8x32xf32>
    %177 = vector.extract_strided_slice %10 {offsets = [48, 0], sizes = [8, 128], strides = [1, 1]} : vector<64x128xf32> to vector<8x128xf32>
    %c0_52 = arith.constant 0 : index
    %c0_53 = arith.constant 0 : index
    %178 = vector.load %arg4[%c0_52, %c0_53] : memref<32x128xf32, #tpu.memory_space<vmem>>, vector<32x128xf32>
    %cst_54 = arith.constant dense<0.000000e+00> : vector<8x128xf32>
    %179 = tpu.matmul %171, %178, %cst_54 {dimension_numbers = #tpu.dot_dimension_numbers<[1], [0], [0], [1], [0, 0, 1, 1], [], []>} : vector<8x32xf32>, vector<32x128xf32>, vector<8x128xf32> -> vector<8x128xf32>
    %180 = arith.addf %177, %179 : vector<8x128xf32>
    %181 = arith.negf %180 : vector<8x128xf32>
    %182 = math.exp %181 : vector<8x128xf32>
    %cst_55 = arith.constant 1.000000e+00 : f32
    %183 = vector.broadcast %cst_55 : f32 to vector<8x128xf32>
    %184 = arith.addf %183, %182 : vector<8x128xf32>
    %185 = arith.divf %183, %184 : vector<8x128xf32>
    %186 = vector.extract_strided_slice %185 {offsets = [0, 0], sizes = [8, 32], strides = [1, 1]} : vector<8x128xf32> to vector<8x32xf32>
    %187 = vector.extract_strided_slice %185 {offsets = [0, 32], sizes = [8, 32], strides = [1, 1]} : vector<8x128xf32> to vector<8x32xf32>
    %188 = vector.extract_strided_slice %185 {offsets = [0, 64], sizes = [8, 32], strides = [1, 1]} : vector<8x128xf32> to vector<8x32xf32>
    %cst_56 = arith.constant 2.000000e+00 : f32
    %189 = vector.broadcast %cst_56 : f32 to vector<8x32xf32>
    %190 = arith.mulf %189, %188 : vector<8x32xf32>
    %cst_57 = arith.constant 1.000000e+00 : f32
    %191 = vector.broadcast %cst_57 : f32 to vector<8x32xf32>
    %192 = arith.subf %190, %191 : vector<8x32xf32>
    %193 = vector.extract_strided_slice %185 {offsets = [0, 96], sizes = [8, 32], strides = [1, 1]} : vector<8x128xf32> to vector<8x32xf32>
    %194 = arith.mulf %187, %169 : vector<8x32xf32>
    %195 = arith.mulf %186, %192 : vector<8x32xf32>
    %196 = arith.addf %194, %195 : vector<8x32xf32>
    %197 = math.tanh %196 : vector<8x32xf32>
    %198 = arith.mulf %193, %197 : vector<8x32xf32>
    %c6_i32 = arith.constant 6 : i32
    %199 = vector.broadcast %c6_i32 : i32 to vector<8x32xi32>
    %200 = arith.cmpi sgt, %11, %199 : vector<8x32xi32>
    %cst_58 = arith.constant 0.000000e+00 : f32
    %201 = vector.broadcast %cst_58 : f32 to vector<8x32xf32>
    %202 = arith.select %200, %198, %201 : vector<8x32xi1>, vector<8x32xf32>
    %203 = arith.maximumf %176, %202 : vector<8x32xf32>
    %204 = vector.extract_strided_slice %10 {offsets = [56, 0], sizes = [8, 128], strides = [1, 1]} : vector<64x128xf32> to vector<8x128xf32>
    %c0_59 = arith.constant 0 : index
    %c0_60 = arith.constant 0 : index
    %205 = vector.load %arg4[%c0_59, %c0_60] : memref<32x128xf32, #tpu.memory_space<vmem>>, vector<32x128xf32>
    %cst_61 = arith.constant dense<0.000000e+00> : vector<8x128xf32>
    %206 = tpu.matmul %198, %205, %cst_61 {dimension_numbers = #tpu.dot_dimension_numbers<[1], [0], [0], [1], [0, 0, 1, 1], [], []>} : vector<8x32xf32>, vector<32x128xf32>, vector<8x128xf32> -> vector<8x128xf32>
    %207 = arith.addf %204, %206 : vector<8x128xf32>
    %208 = arith.negf %207 : vector<8x128xf32>
    %209 = math.exp %208 : vector<8x128xf32>
    %cst_62 = arith.constant 1.000000e+00 : f32
    %210 = vector.broadcast %cst_62 : f32 to vector<8x128xf32>
    %211 = arith.addf %210, %209 : vector<8x128xf32>
    %212 = arith.divf %210, %211 : vector<8x128xf32>
    %213 = vector.extract_strided_slice %212 {offsets = [0, 0], sizes = [8, 32], strides = [1, 1]} : vector<8x128xf32> to vector<8x32xf32>
    %214 = vector.extract_strided_slice %212 {offsets = [0, 32], sizes = [8, 32], strides = [1, 1]} : vector<8x128xf32> to vector<8x32xf32>
    %215 = vector.extract_strided_slice %212 {offsets = [0, 64], sizes = [8, 32], strides = [1, 1]} : vector<8x128xf32> to vector<8x32xf32>
    %cst_63 = arith.constant 2.000000e+00 : f32
    %216 = vector.broadcast %cst_63 : f32 to vector<8x32xf32>
    %217 = arith.mulf %216, %215 : vector<8x32xf32>
    %cst_64 = arith.constant 1.000000e+00 : f32
    %218 = vector.broadcast %cst_64 : f32 to vector<8x32xf32>
    %219 = arith.subf %217, %218 : vector<8x32xf32>
    %220 = vector.extract_strided_slice %212 {offsets = [0, 96], sizes = [8, 32], strides = [1, 1]} : vector<8x128xf32> to vector<8x32xf32>
    %221 = arith.mulf %214, %196 : vector<8x32xf32>
    %222 = arith.mulf %213, %219 : vector<8x32xf32>
    %223 = arith.addf %221, %222 : vector<8x32xf32>
    %224 = math.tanh %223 : vector<8x32xf32>
    %225 = arith.mulf %220, %224 : vector<8x32xf32>
    %c7_i32 = arith.constant 7 : i32
    %226 = vector.broadcast %c7_i32 : i32 to vector<8x32xi32>
    %227 = arith.cmpi sgt, %11, %226 : vector<8x32xi32>
    %cst_65 = arith.constant 0.000000e+00 : f32
    %228 = vector.broadcast %cst_65 : f32 to vector<8x32xf32>
    %229 = arith.select %227, %225, %228 : vector<8x32xi1>, vector<8x32xf32>
    %230 = arith.maximumf %203, %229 : vector<8x32xf32>
    %cst_66 = arith.constant 0.000000e+00 : f32
    %231 = vector.broadcast %cst_66 : f32 to vector<8x32xf32>
    %232 = arith.maximumf %230, %231 : vector<8x32xf32>
    %c0_67 = arith.constant 0 : index
    %c0_68 = arith.constant 0 : index
    %233 = vector.load %arg6[%c0_67, %c0_68] : memref<32x128xf32, #tpu.memory_space<vmem>>, vector<32x128xf32>
    %cst_69 = arith.constant dense<0.000000e+00> : vector<8x128xf32>
    %234 = tpu.matmul %232, %233, %cst_69 {dimension_numbers = #tpu.dot_dimension_numbers<[1], [0], [0], [1], [0, 0, 1, 1], [], []>} : vector<8x32xf32>, vector<32x128xf32>, vector<8x128xf32> -> vector<8x128xf32>
    %c0_70 = arith.constant 0 : index
    %c0_71 = arith.constant 0 : index
    %235 = vector.load %arg7[%c0_70, %c0_71] : memref<1x128xf32, #tpu.memory_space<vmem>>, vector<1x128xf32>
    %236 = vector.broadcast %235 : vector<1x128xf32> to vector<8x128xf32>
    %237 = arith.addf %234, %236 : vector<8x128xf32>
    %cst_72 = arith.constant 0.000000e+00 : f32
    %238 = vector.broadcast %cst_72 : f32 to vector<8x128xf32>
    %239 = arith.maximumf %237, %238 : vector<8x128xf32>
    %c0_73 = arith.constant 0 : index
    %c0_74 = arith.constant 0 : index
    %240 = vector.load %arg8[%c0_73, %c0_74] : memref<128x128xf32, #tpu.memory_space<vmem>>, vector<128x128xf32>
    %cst_75 = arith.constant dense<0.000000e+00> : vector<8x128xf32>
    %241 = tpu.matmul %239, %240, %cst_75 {dimension_numbers = #tpu.dot_dimension_numbers<[1], [0], [0], [1], [0, 0, 1, 1], [], []>} : vector<8x128xf32>, vector<128x128xf32>, vector<8x128xf32> -> vector<8x128xf32>
    %c0_76 = arith.constant 0 : index
    %c0_77 = arith.constant 0 : index
    %242 = vector.load %arg9[%c0_76, %c0_77] : memref<1x128xf32, #tpu.memory_space<vmem>>, vector<1x128xf32>
    %243 = vector.broadcast %242 : vector<1x128xf32> to vector<8x128xf32>
    %244 = arith.addf %241, %243 : vector<8x128xf32>
    %c0_78 = arith.constant 0 : index
    %c0_79 = arith.constant 0 : index
    %245 = vector.load %arg10[%c0_78, %c0_79] : memref<8x128xf32, #tpu.memory_space<vmem>>, vector<8x128xf32>
    tpu.vector_store %arg10[%c0_78, %c0_79], %244 {strides = array<i32>} : memref<8x128xf32, #tpu.memory_space<vmem>>, vector<8x128xf32>,
    return
  }
  func.func @transform_0(%arg0: i32) -> (i32, i32) {
    %c0_i32 = arith.constant 0 : i32
    %c0_i32_0 = arith.constant 0 : i32
    %c0_i32_1 = arith.constant 0 : i32
    return %c0_i32, %c0_i32_0 : i32, i32
  }
  func.func @transform_1(%arg0: i32) -> (i32, i32) {
    %c0_i32 = arith.constant 0 : i32
    %c0_i32_0 = arith.constant 0 : i32
    %c0_i32_1 = arith.constant 0 : i32
    return %c0_i32, %c0_i32_0 : i32, i32
  }
  func.func @transform_2(%arg0: i32) -> (i32, i32) {
    %c0_i32 = arith.constant 0 : i32
    %c0_i32_0 = arith.constant 0 : i32
    %c0_i32_1 = arith.constant 0 : i32
    return %c0_i32, %c0_i32_0 : i32, i32
  }
  func.func @transform_3(%arg0: i32) -> (i32, i32) {
    %c0_i32 = arith.constant 0 : i32
    %c0_i32_0 = arith.constant 0 : i32
    %c0_i32_1 = arith.constant 0 : i32
    return %c0_i32, %c0_i32_0 : i32, i32
  }
  func.func @transform_4(%arg0: i32) -> (i32, i32) {
    %c0_i32 = arith.constant 0 : i32
    %c0_i32_0 = arith.constant 0 : i32
    %c0_i32_1 = arith.constant 0 : i32
    return %c0_i32, %c0_i32_0 : i32, i32
  }
  func.func @transform_5(%arg0: i32) -> (i32, i32) {
    %c0_i32 = arith.constant 0 : i32
    %c0_i32_0 = arith.constant 0 : i32
    %c0_i32_1 = arith.constant 0 : i32
    return %c0_i32, %c0_i32_0 : i32, i32
  }
  func.func @transform_6(%arg0: i32) -> (i32, i32) {
    %c0_i32 = arith.constant 0 : i32
    %c0_i32_0 = arith.constant 0 : i32
    %c0_i32_1 = arith.constant 0 : i32
    return %c0_i32, %c0_i32_0 : i32, i32
  }
  func.func @transform_7(%arg0: i32) -> (i32, i32) {
    %c0_i32 = arith.constant 0 : i32
    %c0_i32_0 = arith.constant 0 : i32
    %c0_i32_1 = arith.constant 0 : i32
    return %c0_i32, %c0_i32_0 : i32, i32
  }
  func.func @transform_8(%arg0: i32) -> (i32, i32) {
    %c0_i32 = arith.constant 0 : i32
    %c0_i32_0 = arith.constant 0 : i32
    %c0_i32_1 = arith.constant 0 : i32
    return %c0_i32, %c0_i32_0 : i32, i32
  }
  func.func @transform_9(%arg0: i32) -> (i32, i32) {
    %c0_i32 = arith.constant 0 : i32
    %c0_i32_0 = arith.constant 0 : i32
    %c0_i32_1 = arith.constant 0 : i32
    return %c0_i32, %c0_i32_0 : i32, i32
  }
}

</mosaic_0001>

<bundles_post_ra>
// kernel: tpu_custom_call.1
= control target key start
LH: loop header
LB: loop body
LE: loop exit
PB: predicated region body
PF: predicated region fallthrough
CT: control target
= control target key end

     0   :  { %14 = vsyncpa [#allocation3], 0  ;;  %s1360_s0 = inlined_call_operand.vmem [shape: s32[64,1], index: 0, kind: input, shape index: {}]   ;;  %s1361_s1 = inlined_call_operand.hbm [shape: s32[8,32], index: 1, kind: input, shape index: {}]   ;;  %s1362_s2 = inlined_call_operand.hbm [shape: f32[128,128], index: 2, kind: input, shape index: {}]   ;;  %s1363_s3 = inlined_call_operand.vmem [shape: f32[32,128], index: 3, kind: input, shape index: {}]   ;;  %s1364_s4 = inlined_call_operand.vmem [shape: f32[1,128], index: 4, kind: input, shape index: {}]   ;;  %s1365_s5 = inlined_call_operand.vmem [shape: f32[32,128], index: 5, kind: input, shape index: {}]   ;;  %s1366_s6 = inlined_call_operand.vmem [shape: f32[1,128], index: 6, kind: input, shape index: {}]   ;;  %s1367_s7 = inlined_call_operand.hbm [shape: f32[128,128], index: 7, kind: input, shape index: {}]   ;;  %s1368_s8 = inlined_call_operand.vmem [shape: f32[1,128], index: 8, kind: input, shape index: {}]   ;;  %s1369_s9 = inlined_call_operand.hbm [shape: f32[8,128], index: 9, kind: output, shape index: {}]  }
   0x1   :  { %15 = vsyncpa [#allocation6], 0  ;;  %s34_s11 = sshll.u32 %s1362_s2, 4  ;;  %s35_s11 = int_to_ptr.hbm [resolvable:$true] %s34_s11 }
   0x2   :  { %16 = vsyncpa [#allocation4], 0  ;;  %s1078_s12 = smov [#allocation5]   ;;  %s24_s16 = sshll.u32 %s1361_s1, 4  ;;  %s25_s16 = int_to_ptr.hbm [resolvable:$true] %s24_s16 }
   0x3   :  { %s36_s13 = sshll.u32 %s1078_s12, 4  ;;  %s1079_s17 = smov 128   ;;  %s37_s13 = int_to_ptr.vmem [resolvable:$true] %s36_s13 }
   0x4   :  { %s1080_s18 = smov 8   ;;  %s1081_s19 = smov [#allocation2]  }
   0x5   :  { %42 = dma.hbm_to_vmem [thread:$0]  %s35_s11, 2048, %s37_s13, [#allocation6], %s1079_s17, %s1079_s17, %s1080_s18  }
   0x6   :  { %s26_s20 = sshll.u32 %s1081_s19, 4  ;;  %s55_s23 = sshll.u32 %s1367_s7, 4  ;;  %s27_s20 = int_to_ptr.vmem [resolvable:$true] %s26_s20  ;;  %s56_s23 = int_to_ptr.hbm [resolvable:$true] %s55_s23 }
   0x7   :  { %29 = dma.hbm_to_vmem [thread:$0]  %s25_s16, 128, %s27_s20, [#allocation3]  }
   0x8   :  { %s1082_s2 = smov [#allocation7]  }
   0x9   :  { %s57_s24 = sshll.u32 %s1082_s2, 4  ;;  %s58_s24 = int_to_ptr.vmem [resolvable:$true] %s57_s24 }
   0xa   :  { %63 = dma.hbm_to_vmem [thread:$0]  %s56_s23, 2048, %s58_s24, [#allocation6], %s1079_s17, %s1079_s17, %s1080_s18  }
   0xb   :  { %1072 = dma.done.wait [#allocation3], 128  }
   0xc   :  { %1073 = vsyncadd [#allocation3], 4294967168 }
   0xd   :  { %1074 = dma.done.wait [#allocation6], 4096  }
   0xe   :  { %1075 = vsyncadd [#allocation6], 4294963200  ;;  %v1083_v0 = vmov 0   ;;  %v80_v1 = vld [vmem:[%s1360_s0] sm:$0xff]  ;;  %v150_v3 = vld [vmem:[#allocation5 + $0x70] sm:$0xff]  ;;  %v1084_v22 = vmov 0.0   ;;  %v78_v23 = vlaneseq }
   0xf   :  { %922 = vset.pattern.permute.xlu0 %v1083_v0  ;;  %923 = vset.pattern.permute.xlu2 %v1083_v0  ;;  %v151_v2 = vld [vmem:[#allocation5 + $0x78] sm:$0xff]  ;;  %v149_v4 = vld [vmem:[#allocation5 + $0x68] sm:$0xff]  ;;  %v148_v5 = vld [vmem:[#allocation5 + $0x60] sm:$0xff]  ;;  %v1085_v26 = vmov 1.0   ;;  %s1087_s13 = smov 32   ;;  %vm202_vm8 = vcmask 261120  }
  0x10   :  { %924 = vset.pattern.permute.xlu1 %v1083_v0  ;;  %89 = vperm.xlu0 %922, %v80_v1   ;;  %v147_v6 = vld [vmem:[#allocation5 + $0x58] sm:$0xff]  ;;  %v1154_v7 = vld [vmem:[%s1363_s3 + $0x18] sm:$0xff]  ;;  %v1159_v8 = vld [vmem:[%s1363_s3 + $0x10] sm:$0xff]  ;;  %v1191_v24 = vand.u32 127, %v78_v23  ;;  %s828_s16 = sshll.u32 %s1369_s9, 4  ;;  %s829_s16 = int_to_ptr.hbm [resolvable:$true] %s828_s16 }
  0x11   :  { %156 = vmatpush.msra.mxu0 %v151_v2  ;;  %879 = vmatpush.msra.mxu2 %v151_v2  ;;  %v146_v9 = vld [vmem:[#allocation5 + $0x50] sm:$0xff]  ;;  %v145_v10 = vld [vmem:[#allocation5 + $0x48] sm:$0xff]  ;;  %v144_v11 = vld [vmem:[#allocation5 + $0x40] sm:$0xff] }
  0x12   :  { %880 = vmatpush.msra.mxu3 %v151_v2  ;;  %218 = vmatpush.msra.mxu1 %v1154_v7  ;;  %v143_v12 = vld [vmem:[#allocation5 + $0x38] sm:$0xff]  ;;  %v142_v13 = vld [vmem:[#allocation5 + $0x30] sm:$0xff]  ;;  %v141_v14 = vld [vmem:[#allocation5 + $0x28] sm:$0xff] }
  0x13   :  { %157 = vmatpush.msra.mxu0 %v150_v3  ;;  %881 = vmatpush.msra.mxu2 %v150_v3  ;;  %v140_v15 = vld [vmem:[#allocation5 + $0x20] sm:$0xff]  ;;  %v139_v16 = vld [vmem:[#allocation5 + $0x18] sm:$0xff]  ;;  %v138_v17 = vld [vmem:[#allocation5 + $0x10] sm:$0xff] }
  0x14   :  { %882 = vmatpush.msra.mxu3 %v150_v3  ;;  %219 = vmatpush.msra.mxu1 %v1159_v8  ;;  %v137_v18 = vld [vmem:[#allocation5 + $0x8] sm:$0xff]  ;;  %v136_v19 = vld [vmem:[#allocation5] sm:$0xff]  ;;  %v1172_v21 = vld [vmem:[%s1363_s3] sm:$0xff] }
  0x15   :  { %158 = vmatpush.msra.mxu0 %v149_v4  ;;  %883 = vmatpush.msra.mxu2 %v149_v4  ;;  %v1166_v20 = vld [vmem:[%s1363_s3 + $0x8] sm:$0xff]  ;;  %v1198_v27 = vld [vmem:[%s1364_s4] ss:$0 sm:$0xff]  ;;  %s1086_s4 = smov 64   ;;  %v86_v23 = vld [vmem:[%s1360_s0 + $0x30] sm:$0xff] }
  0x16   :  { %884 = vmatpush.msra.mxu3 %v149_v4  ;;  %220 = vmatpush.msra.mxu1 %v1166_v20  ;;  %v84_v53 = vld [vmem:[%s1360_s0 + $0x20] sm:$0xff]  ;;  %v81_v54 = vld [vmem:[%s1360_s0 + $0x8] sm:$0xff] }
  0x17   :  { %159 = vmatpush.msra.mxu0 %v148_v5  ;;  %885 = vmatpush.msra.mxu2 %v148_v5  ;;  %v85_v55 = vld [vmem:[%s1360_s0 + $0x28] sm:$0xff] }
  0x18   :  { %886 = vmatpush.msra.mxu3 %v148_v5  ;;  %221 = vmatpush.msra.mxu1 %v1172_v21 }
  0x19   :  { %160 = vmatpush.msra.mxu0 %v147_v6  ;;  %887 = vmatpush.msra.mxu2 %v147_v6 }
  0x1a   :  { %888 = vmatpush.msra.mxu3 %v147_v6  ;;  %222 = vmatmul.f32.vlgmr.msra.gmra.mxu1 %v1084_v22 }
  0x1b   :  { %161 = vmatpush.msra.mxu0 %v146_v9  ;;  %889 = vmatpush.msra.mxu2 %v146_v9 }
  0x1c   :  { %890 = vmatpush.msra.mxu3 %v146_v9  ;;  %421 = vmatpush.msrb.mxu1 %v1154_v7 }
  0x1d   :  { %162 = vmatpush.msra.mxu0 %v145_v10  ;;  %891 = vmatpush.msra.mxu2 %v145_v10 }
  0x1e   :  { %892 = vmatpush.msra.mxu3 %v145_v10  ;;  %422 = vmatpush.msrb.mxu1 %v1159_v8 }
  0x1f   :  { %163 = vmatpush.msra.mxu0 %v144_v11  ;;  %893 = vmatpush.msra.mxu2 %v144_v11 }
  0x20   :  { %894 = vmatpush.msra.mxu3 %v144_v11  ;;  %423 = vmatpush.msrb.mxu1 %v1166_v20 }
  0x21   :  { %164 = vmatpush.msra.mxu0 %v143_v12  ;;  %895 = vmatpush.msra.mxu2 %v143_v12 }
  0x22   :  { %896 = vmatpush.msra.mxu3 %v143_v12  ;;  %424 = vmatpush.msrb.mxu1 %v1172_v21 }
  0x23   :  { %165 = vmatpush.msra.mxu0 %v142_v13  ;;  %897 = vmatpush.msra.mxu2 %v142_v13 }
  0x24   :  { %898 = vmatpush.msra.mxu3 %v142_v13  ;;  %625 = vmatpush.msra.mxu1 %v1154_v7 }
  0x25   :  { %166 = vmatpush.msra.mxu0 %v141_v14  ;;  %899 = vmatpush.msra.mxu2 %v141_v14 }
  0x26   :  { %900 = vmatpush.msra.mxu3 %v141_v14  ;;  %626 = vmatpush.msra.mxu1 %v1159_v8 }
  0x27   :  { %167 = vmatpush.msra.mxu0 %v140_v15  ;;  %901 = vmatpush.msra.mxu2 %v140_v15 }
  0x28   :  { %902 = vmatpush.msra.mxu3 %v140_v15  ;;  %627 = vmatpush.msra.mxu1 %v1166_v20 }
  0x29   :  { %168 = vmatpush.msra.mxu0 %v139_v16  ;;  %903 = vmatpush.msra.mxu2 %v139_v16 }
  0x2a   :  { %904 = vmatpush.msra.mxu3 %v139_v16  ;;  %628 = vmatpush.msra.mxu1 %v1172_v21 }
  0x2b   :  { %169 = vmatpush.msra.mxu0 %v138_v17  ;;  %905 = vmatpush.msra.mxu2 %v138_v17 }
  0x2c   :  { %906 = vmatpush.msra.mxu3 %v138_v17  ;;  %101 = vperm.xlu2 %923, %v84_v53  }
  0x2d   :  { %170 = vmatpush.msra.mxu0 %v137_v18  ;;  %907 = vmatpush.msra.mxu2 %v137_v18 }
  0x2e   :  { %908 = vmatpush.msra.mxu3 %v137_v18 }
  0x2f   :  { %171 = vmatpush.msra.mxu0 %v136_v19  ;;  %909 = vmatpush.msra.mxu2 %v136_v19 }
  0x30   :  { %910 = vmatpush.msra.mxu3 %v136_v19 }
  0x31   :  { %285 = vmatpush.msrb.mxu2 %v1154_v7 }
  0x32   :  { %353 = vmatpush.msrb.mxu3 %v1154_v7 }
  0x33   :  { %286 = vmatpush.msrb.mxu2 %v1159_v8 }
  0x34   :  { %354 = vmatpush.msrb.mxu3 %v1159_v8  ;;  %104 = vperm.xlu2 %923, %v85_v55  }
  0x35   :  { %287 = vmatpush.msrb.mxu2 %v1166_v20 }
  0x36   :  { %355 = vmatpush.msrb.mxu3 %v1166_v20 }
  0x37   :  { %288 = vmatpush.msrb.mxu2 %v1172_v21 }
  0x38   :  { %356 = vmatpush.msrb.mxu3 %v1172_v21 }
  0x82   :  { %v90_v25 = vpop.permute.xlu0 %89 }
  0x83   :  { %vm112_vm0 = vcmp.eq.s32.totalorder %v1191_v24, %v90_v25  ;;  %v82_v25 = vld [vmem:[%s1360_s0 + $0x10] sm:$0xff] }
  0x84   :  { %847 = vmatmul.msk.f32.vlgmr.msra.gmra.mxu0 %vm112_vm0, %v1085_v26 }
  0x86   :  { %v102_v58 = vpop.permute.xlu2 %101 }
  0x87   :  { %vm116_vm5 = vcmp.eq.s32.totalorder %v1191_v24, %v102_v58  ;;  %v83_v58 = vld [vmem:[%s1360_s0 + $0x18] sm:$0xff] }
  0x88   :  { %851 = vmatmul.msk.f32.vlgmr.msra.gmra.mxu2 %vm116_vm5, %v1085_v26 }
  0x89   :  { %489 = vmatpush.msra.mxu2 %v1154_v7 }
  0x8b   :  { %490 = vmatpush.msra.mxu2 %v1159_v8 }
  0x8d   :  { %491 = vmatpush.msra.mxu2 %v1166_v20 }
  0x8e   :  { %v105_v59 = vpop.permute.xlu2 %104 }
  0x8f   :  { %vm117_vm6 = vcmp.eq.s32.totalorder %v1191_v24, %v105_v59  ;;  %492 = vmatpush.msra.mxu2 %v1172_v21 }
  0x90   :  { %852 = vmatmul.msk.f32.gmra.mxu2 %vm117_vm6, %v1085_v26 }
  0x97   :  { %v223_v29 = vpop.f32.mrf.mxu1 }
 0x101   :  { %v173_v28 = vpop.f32.mrf.mxu0 }
 0x102   :  { %v174_v30 = vadd.f32 %v1198_v27, %v173_v28 }
 0x104   :  { %v226_v31 = vadd.f32 %v223_v29, %v174_v30 }
 0x106   :  { %v855_v32 = vmul.f32 -1.442695, %v226_v31  ;;  %v87_v31 = vld [vmem:[%s1360_s0 + $0x38] sm:$0xff] }
 0x108   :  { %928 = vpow2.f32 %v855_v32 }
 0x10b   :  { %v1235_v62 = vpop.f32.mrf.mxu2 }
 0x10e   :  { %v929_v33 = vpop.eup %928 }
 0x10f   :  { %v230_v34 = vadd.f32 1.0, %v929_v33 }
 0x111   :  { %930 = vrcp.f32 %v230_v34  ;;  %v242_v38 = vand.u32 2147483648, %v230_v34  ;;  %v240_v40 = vand.u32 2147483647, %v230_v34  ;;  %vm236_vm2 = vweird.f32 %v230_v34 }
 0x113   :  { %v243_v42 = vor.u32 1.1754944e-38, %v242_v38  ;;  %vm241_vm4 = vcmp.eq.f32.partialorder %v240_v40, 8.507059e+37  ;;  %v1237_v63 = vpop.f32.mrf.mxu2 }
 0x117   :  { %v931_v35 = vpop.eup %930 }
 0x118   :  { %v232_v36 = vmul.f32 %v931_v35, %v230_v34  ;;  %vm237_vm1 = vweird.f32 %v931_v35 }
 0x119   :  { %vm238_vm3 = vmor %vm236_vm2, %vm237_vm1 }
 0x11a   :  { %v233_v37 = vsub.f32 1.0, %v232_v36 }
 0x11c   :  { %v234_v39 = vmul.f32 %v931_v35, %v233_v37 }
 0x11e   :  { %v235_v41 = vadd.f32 %v931_v35, %v234_v39 }
 0x120   :  { %v239_v43 = vsel %vm238_vm3, %v931_v35, %v235_v41 }
 0x121   :  { %v244_v44 = vsel %vm241_vm4, %v243_v42, %v239_v43 }
 0x122   :  { %v246_v45 = vmul.f32 2.0, %v244_v44  ;;  %v248_v49 = vmul.f32 0.0, %v244_v44 }
 0x124   :  { %v856_v46 = vadd.f32 -1.0, %v246_v45 }
 0x126   :  { %250 = vrot.lane.b32.xlu0 %v856_v46, %s1086_s4 }
 0x198   :  { %v251_v47 = vpop.permute.xlu0 %250 }
 0x199   :  { %v253_v48 = vmul.f32 %v251_v47, %v244_v44 }
 0x19b   :  { %255 = vrot.lane.b32.xlu1 %v253_v48, %s1087_s13 }
 0x20d   :  { %v256_v50 = vpop.permute.xlu1 %255 }
 0x20e   :  { %v1203_v51 = vadd.f32 %v256_v50, %v248_v49 }
 0x210   :  { %932 = vtanh.f32 %v1203_v51 }
 0x216   :  { %v933_v52 = vpop.eup %932 }
 0x217   :  { %261 = vrot.lane.b32.xlu1 %v933_v52, %s1086_s4 }
 0x21f   :  { %92 = vperm.xlu1 %924, %v81_v54  }
 0x289   :  { %v262_v56 = vpop.permute.xlu1 %261 }
 0x28a   :  { %v264_v57 = vmul.f32 %v262_v56, %v244_v44 }
 0x28c   :  { %267 = vrot.lane.b32.xlu0 %v264_v57, %s1087_s13 }
 0x291   :  { %v93_v60 = vpop.permute.xlu1 %92 }
 0x292   :  { %vm113_vm7 = vcmp.eq.s32.totalorder %v1191_v24, %v93_v60 }
 0x293   :  { %848 = vmatmul.msk.f32.gmra.mxu0 %vm113_vm7, %v1085_v26 }
 0x2fe   :  { %v1227_v61 = vpop.permute.xlu0 %267 }
 0x2ff   :  { %857 = vmatmul.msk.f32.vlgmr.msrb.gmra.mxu2 %vm202_vm8, %v1227_v61 }
 0x300   :  { %693 = vmatpush.msrb.mxu2 %v1154_v7 }
 0x302   :  { %694 = vmatpush.msrb.mxu2 %v1159_v8 }
 0x304   :  { %695 = vmatpush.msrb.mxu2 %v1166_v20 }
 0x306   :  { %696 = vmatpush.msrb.mxu2 %v1172_v21 }
 0x310   :  { %v176_v0 = vpop.f32.mrf.mxu0 }
 0x311   :  { %v177_v1 = vadd.f32 %v1198_v27, %v176_v0 }
 0x382   :  { %v290_v2 = vpop.f32.mrf.mxu2 }
 0x383   :  { %v293_v3 = vadd.f32 %v290_v2, %v177_v1 }
 0x385   :  { %v858_v4 = vmul.f32 -1.442695, %v293_v3 }
 0x387   :  { %934 = vpow2.f32 %v858_v4 }
 0x38d   :  { %v935_v5 = vpop.eup %934 }
 0x38e   :  { %v297_v6 = vadd.f32 1.0, %v935_v5 }
 0x390   :  { %936 = vrcp.f32 %v297_v6  ;;  %v309_v12 = vand.u32 2147483648, %v297_v6  ;;  %v307_v14 = vand.u32 2147483647, %v297_v6  ;;  %vm303_vm10 = vweird.f32 %v297_v6 }
 0x392   :  { %v310_v16 = vor.u32 1.1754944e-38, %v309_v12  ;;  %vm308_vm12 = vcmp.eq.f32.partialorder %v307_v14, 8.507059e+37 }
 0x396   :  { %v937_v9 = vpop.eup %936 }
 0x397   :  { %v299_v10 = vmul.f32 %v937_v9, %v297_v6  ;;  %vm304_vm9 = vweird.f32 %v937_v9 }
 0x398   :  { %vm305_vm11 = vmor %vm303_vm10, %vm304_vm9 }
 0x399   :  { %v300_v11 = vsub.f32 1.0, %v299_v10 }
 0x39b   :  { %v301_v13 = vmul.f32 %v937_v9, %v300_v11 }
 0x39d   :  { %v302_v15 = vadd.f32 %v937_v9, %v301_v13 }
 0x39f   :  { %v306_v17 = vsel %vm305_vm11, %v937_v9, %v302_v15 }
 0x3a0   :  { %v311_v18 = vsel %vm308_vm12, %v310_v16, %v306_v17 }
 0x3a1   :  { %v313_v19 = vmul.f32 2.0, %v311_v18  ;;  %v315_v33 = vmul.f32 %v311_v18, %v1203_v51 }
 0x3a3   :  { %v859_v22 = vadd.f32 -1.0, %v313_v19 }
 0x3a5   :  { %317 = vrot.lane.b32.xlu2 %v859_v22, %s1086_s4 }
 0x3ad   :  { %107 = vperm.xlu2 %923, %v86_v23  }
 0x3b5   :  { %95 = vperm.xlu2 %923, %v82_v25  }
 0x3ff   :  { %v318_v28 = vpop.permute.xlu2 %317 }
 0x400   :  { %v320_v29 = vmul.f32 %v318_v28, %v311_v18 }
 0x402   :  { %322 = vrot.lane.b32.xlu0 %v320_v29, %s1087_s13 }
 0x407   :  { %v108_v30 = vpop.permute.xlu2 %107 }
 0x408   :  { %vm118_vm13 = vcmp.eq.s32.totalorder %v1191_v24, %v108_v30 }
 0x409   :  { %853 = vmatmul.msk.f32.vlgmr.msra.gmra.mxu3 %vm118_vm13, %v1085_v26 }
 0x40a   :  { %110 = vperm.xlu0 %922, %v87_v31   ;;  %557 = vmatpush.msra.mxu3 %v1154_v7 }
 0x40c   :  { %558 = vmatpush.msra.mxu3 %v1159_v8 }
 0x40e   :  { %559 = vmatpush.msra.mxu3 %v1166_v20 }
 0x40f   :  { %v96_v32 = vpop.permute.xlu2 %95 }
 0x410   :  { %vm114_vm14 = vcmp.eq.s32.totalorder %v1191_v24, %v96_v32  ;;  %560 = vmatpush.msra.mxu3 %v1172_v21 }
 0x411   :  { %849 = vmatmul.msk.f32.gmra.mxu0 %vm114_vm14, %v1085_v26 }
 0x474   :  { %v323_v34 = vpop.permute.xlu0 %322 }
 0x475   :  { %v325_v35 = vadd.f32 %v323_v34, %v315_v33 }
 0x477   :  { %938 = vtanh.f32 %v325_v35 }
 0x47c   :  { %v111_v36 = vpop.permute.xlu0 %110 }
 0x47d   :  { %v939_v37 = vpop.eup %938  ;;  %vm119_vm15 = vcmp.eq.s32.totalorder %v1191_v24, %v111_v36 }
 0x47e   :  { %328 = vrot.lane.b32.xlu1 %v939_v37, %s1086_s4  ;;  %854 = vmatmul.msk.f32.gmra.mxu3 %vm119_vm15, %v1085_v26 }
 0x48c   :  { %v1268_v21 = vpop.f32.mrf.mxu3 }
 0x48e   :  { %v179_v39 = vpop.f32.mrf.mxu0 }
 0x48f   :  { %v180_v40 = vadd.f32 %v1198_v27, %v179_v39 }
 0x4f0   :  { %v329_v7 = vpop.permute.xlu1 %328 }
 0x4f1   :  { %v331_v8 = vmul.f32 %v329_v7, %v311_v18 }
 0x4f3   :  { %334 = vrot.lane.b32.xlu1 %v331_v8, %s1087_s13 }
 0x501   :  { %v1270_v38 = vpop.f32.mrf.mxu3 }
 0x565   :  { %v1264_v20 = vpop.permute.xlu1 %334 }
 0x566   :  { %860 = vmatmul.msk.f32.vlgmr.msrb.gmra.mxu3 %vm202_vm8, %v1264_v20 }
 0x5e9   :  { %v358_v41 = vpop.f32.mrf.mxu3 }
 0x5ea   :  { %v361_v42 = vadd.f32 %v358_v41, %v180_v40  ;;  %v186_v40 = vadd.f32 %v1198_v27, %v1235_v62 }
 0x5ec   :  { %v861_v43 = vmul.f32 -1.442695, %v361_v42 }
 0x5ee   :  { %940 = vpow2.f32 %v861_v43 }
 0x5f4   :  { %v941_v44 = vpop.eup %940 }
 0x5f5   :  { %v365_v45 = vadd.f32 1.0, %v941_v44 }
 0x5f7   :  { %942 = vrcp.f32 %v365_v45  ;;  %v377_v49 = vand.u32 2147483648, %v365_v45  ;;  %v375_v51 = vand.u32 2147483647, %v365_v45  ;;  %vm371_vm1 = vweird.f32 %v365_v45 }
 0x5f9   :  { %v378_v53 = vor.u32 1.1754944e-38, %v377_v49  ;;  %vm376_vm3 = vcmp.eq.f32.partialorder %v375_v51, 8.507059e+37 }
 0x5fd   :  { %v943_v46 = vpop.eup %942 }
 0x5fe   :  { %v367_v47 = vmul.f32 %v943_v46, %v365_v45  ;;  %vm372_vm0 = vweird.f32 %v943_v46 }
 0x5ff   :  { %vm373_vm2 = vmor %vm371_vm1, %vm372_vm0 }
 0x600   :  { %v368_v48 = vsub.f32 1.0, %v367_v47 }
 0x602   :  { %v369_v50 = vmul.f32 %v943_v46, %v368_v48 }
 0x604   :  { %v370_v52 = vadd.f32 %v943_v46, %v369_v50 }
 0x606   :  { %v374_v54 = vsel %vm373_vm2, %v943_v46, %v370_v52 }
 0x607   :  { %v379_v55 = vsel %vm376_vm3, %v378_v53, %v374_v54 }
 0x608   :  { %v381_v56 = vmul.f32 2.0, %v379_v55  ;;  %v383_v1 = vmul.f32 %v379_v55, %v325_v35 }
 0x60a   :  { %v862_v57 = vadd.f32 -1.0, %v381_v56 }
 0x60c   :  { %385 = vrot.lane.b32.xlu0 %v862_v57, %s1086_s4 }
 0x614   :  { %98 = vperm.xlu0 %922, %v83_v58  }
 0x67e   :  { %v386_v59 = vpop.permute.xlu0 %385 }
 0x67f   :  { %v388_v60 = vmul.f32 %v386_v59, %v379_v55 }
 0x681   :  { %390 = vrot.lane.b32.xlu1 %v388_v60, %s1087_s13 }
 0x686   :  { %v99_v0 = vpop.permute.xlu0 %98 }
 0x687   :  { %vm115_vm4 = vcmp.eq.s32.totalorder %v1191_v24, %v99_v0 }
 0x688   :  { %850 = vmatmul.msk.f32.gmra.mxu0 %vm115_vm4, %v1085_v26 }
 0x6f3   :  { %v391_v2 = vpop.permute.xlu1 %390 }
 0x6f4   :  { %v393_v3 = vadd.f32 %v391_v2, %v383_v1 }
 0x6f6   :  { %944 = vtanh.f32 %v393_v3 }
 0x6fc   :  { %v945_v4 = vpop.eup %944 }
 0x6fd   :  { %396 = vrot.lane.b32.xlu2 %v945_v4, %s1086_s4 }
 0x705   :  { %v182_v10 = vpop.f32.mrf.mxu0 }
 0x706   :  { %v183_v24 = vadd.f32 %v1198_v27, %v182_v10 }
 0x757   :  { %v397_v5 = vpop.permute.xlu2 %396 }
 0x758   :  { %v399_v6 = vmul.f32 %v397_v5, %v379_v55  ;;  %v189_v5 = vadd.f32 %v1198_v27, %v1237_v63 }
 0x75a   :  { %402 = vrot.lane.b32.xlu1 %v399_v6, %s1087_s13 }
 0x7cc   :  { %v1282_v9 = vpop.permute.xlu1 %402 }
 0x7cd   :  { %863 = vmatmul.msk.f32.vlgmr.msrb.gmra.mxu1 %vm202_vm8, %v1282_v9 }
 0x84a   :  { %v426_v26 = vpop.f32.mrf.mxu1 }
 0x84b   :  { %v429_v11 = vadd.f32 %v426_v26, %v183_v24 }
 0x84d   :  { %v864_v12 = vmul.f32 -1.442695, %v429_v11 }
 0x84f   :  { %946 = vpow2.f32 %v864_v12 }
 0x855   :  { %v947_v13 = vpop.eup %946 }
 0x856   :  { %v433_v14 = vadd.f32 1.0, %v947_v13 }
 0x858   :  { %948 = vrcp.f32 %v433_v14  ;;  %v445_v18 = vand.u32 2147483648, %v433_v14  ;;  %v443_v22 = vand.u32 2147483647, %v433_v14  ;;  %vm439_vm6 = vweird.f32 %v433_v14 }
 0x85a   :  { %v446_v25 = vor.u32 1.1754944e-38, %v445_v18  ;;  %vm444_vm9 = vcmp.eq.f32.partialorder %v443_v22, 8.507059e+37 }
 0x85e   :  { %v949_v15 = vpop.eup %948 }
 0x85f   :  { %v435_v16 = vmul.f32 %v949_v15, %v433_v14  ;;  %vm440_vm5 = vweird.f32 %v949_v15 }
 0x860   :  { %vm441_vm7 = vmor %vm439_vm6, %vm440_vm5 }
 0x861   :  { %v436_v17 = vsub.f32 1.0, %v435_v16 }
 0x863   :  { %v437_v19 = vmul.f32 %v949_v15, %v436_v17 }
 0x865   :  { %v438_v23 = vadd.f32 %v949_v15, %v437_v19 }
 0x867   :  { %v442_v28 = vsel %vm441_vm7, %v949_v15, %v438_v23 }
 0x868   :  { %v447_v29 = vsel %vm444_vm9, %v446_v25, %v442_v28 }
 0x869   :  { %v449_v30 = vmul.f32 2.0, %v447_v29  ;;  %v451_v34 = vmul.f32 %v447_v29, %v393_v3 }
 0x86b   :  { %v865_v31 = vadd.f32 -1.0, %v449_v30 }
 0x86d   :  { %453 = vrot.lane.b32.xlu2 %v865_v31, %s1086_s4 }
 0x8c7   :  { %v454_v32 = vpop.permute.xlu2 %453 }
 0x8c8   :  { %v456_v33 = vmul.f32 %v454_v32, %v447_v29 }
 0x8ca   :  { %458 = vrot.lane.b32.xlu0 %v456_v33, %s1087_s13 }
 0x93c   :  { %v459_v35 = vpop.permute.xlu0 %458 }
 0x93d   :  { %v461_v36 = vadd.f32 %v459_v35, %v451_v34 }
 0x93f   :  { %950 = vtanh.f32 %v461_v36 }
 0x945   :  { %v951_v37 = vpop.eup %950 }
 0x946   :  { %464 = vrot.lane.b32.xlu1 %v951_v37, %s1086_s4  ;;  %v192_v37 = vadd.f32 %v1198_v27, %v1268_v21 }
 0x9b8   :  { %v465_v7 = vpop.permute.xlu1 %464 }
 0x9b9   :  { %v467_v8 = vmul.f32 %v465_v7, %v447_v29 }
 0x9bb   :  { %470 = vrot.lane.b32.xlu2 %v467_v8, %s1087_s13 }
 0xa15   :  { %v1291_v39 = vpop.permute.xlu2 %470 }
 0xa16   :  { %866 = vmatmul.msk.f32.vlgmr.msra.gmra.mxu2 %vm202_vm8, %v1291_v39 }
 0xa99   :  { %v494_v41 = vpop.f32.mrf.mxu2 }
 0xa9a   :  { %v497_v42 = vadd.f32 %v494_v41, %v186_v40 }
 0xa9c   :  { %v867_v43 = vmul.f32 -1.442695, %v497_v42 }
 0xa9e   :  { %952 = vpow2.f32 %v867_v43 }
 0xaa4   :  { %v953_v44 = vpop.eup %952 }
 0xaa5   :  { %v501_v45 = vadd.f32 1.0, %v953_v44 }
 0xaa7   :  { %954 = vrcp.f32 %v501_v45  ;;  %v513_v49 = vand.u32 2147483648, %v501_v45  ;;  %v511_v51 = vand.u32 2147483647, %v501_v45  ;;  %vm507_vm11 = vweird.f32 %v501_v45 }
 0xaa9   :  { %v514_v53 = vor.u32 1.1754944e-38, %v513_v49  ;;  %vm512_vm13 = vcmp.eq.f32.partialorder %v511_v51, 8.507059e+37 }
 0xaad   :  { %v955_v46 = vpop.eup %954 }
 0xaae   :  { %v503_v47 = vmul.f32 %v955_v46, %v501_v45  ;;  %vm508_vm10 = vweird.f32 %v955_v46 }
 0xaaf   :  { %vm509_vm12 = vmor %vm507_vm11, %vm508_vm10 }
 0xab0   :  { %v504_v48 = vsub.f32 1.0, %v503_v47 }
 0xab2   :  { %v505_v50 = vmul.f32 %v955_v46, %v504_v48 }
 0xab4   :  { %v506_v52 = vadd.f32 %v955_v46, %v505_v50 }
 0xab6   :  { %v510_v54 = vsel %vm509_vm12, %v955_v46, %v506_v52 }
 0xab7   :  { %v515_v62 = vsel %vm512_vm13, %v514_v53, %v510_v54 }
 0xab8   :  { %v517_v55 = vmul.f32 2.0, %v515_v62  ;;  %v519_v59 = vmul.f32 %v515_v62, %v461_v36 }
 0xaba   :  { %v868_v56 = vadd.f32 -1.0, %v517_v55 }
 0xabc   :  { %521 = vrot.lane.b32.xlu0 %v868_v56, %s1086_s4 }
 0xb2e   :  { %v522_v57 = vpop.permute.xlu0 %521 }
 0xb2f   :  { %v524_v58 = vmul.f32 %v522_v57, %v515_v62 }
 0xb31   :  { %526 = vrot.lane.b32.xlu1 %v524_v58, %s1087_s13 }
 0xba3   :  { %v527_v60 = vpop.permute.xlu1 %526 }
 0xba4   :  { %v529_v0 = vadd.f32 %v527_v60, %v519_v59 }
 0xba6   :  { %956 = vtanh.f32 %v529_v0 }
 0xbac   :  { %v957_v1 = vpop.eup %956 }
 0xbad   :  { %532 = vrot.lane.b32.xlu2 %v957_v1, %s1086_s4  ;;  %v195_v1 = vadd.f32 %v1198_v27, %v1270_v38 }
 0xc07   :  { %v533_v2 = vpop.permute.xlu2 %532 }
 0xc08   :  { %v535_v3 = vmul.f32 %v533_v2, %v515_v62 }
 0xc0a   :  { %538 = vrot.lane.b32.xlu0 %v535_v3, %s1087_s13 }
 0xc7c   :  { %v1301_v4 = vpop.permute.xlu0 %538 }
 0xc7d   :  { %869 = vmatmul.msk.f32.vlgmr.msra.gmra.mxu3 %vm202_vm8, %v1301_v4 }
 0xd00   :  { %v562_v6 = vpop.f32.mrf.mxu3 }
 0xd01   :  { %v565_v10 = vadd.f32 %v562_v6, %v189_v5 }
 0xd03   :  { %v870_v24 = vmul.f32 -1.442695, %v565_v10 }
 0xd05   :  { %958 = vpow2.f32 %v870_v24 }
 0xd0b   :  { %v959_v26 = vpop.eup %958 }
 0xd0c   :  { %v569_v11 = vadd.f32 1.0, %v959_v26 }
 0xd0e   :  { %960 = vrcp.f32 %v569_v11  ;;  %v581_v15 = vand.u32 2147483648, %v569_v11  ;;  %v579_v17 = vand.u32 2147483647, %v569_v11  ;;  %vm575_vm15 = vweird.f32 %v569_v11 }
 0xd10   :  { %v582_v19 = vor.u32 1.1754944e-38, %v581_v15  ;;  %vm580_vm1 = vcmp.eq.f32.partialorder %v579_v17, 8.507059e+37 }
 0xd14   :  { %v961_v12 = vpop.eup %960 }
 0xd15   :  { %v571_v13 = vmul.f32 %v961_v12, %v569_v11  ;;  %vm576_vm14 = vweird.f32 %v961_v12 }
 0xd16   :  { %vm577_vm0 = vmor %vm575_vm15, %vm576_vm14 }
 0xd17   :  { %v572_v14 = vsub.f32 1.0, %v571_v13 }
 0xd19   :  { %v573_v16 = vmul.f32 %v961_v12, %v572_v14 }
 0xd1b   :  { %v574_v18 = vadd.f32 %v961_v12, %v573_v16 }
 0xd1d   :  { %v578_v22 = vsel %vm577_vm0, %v961_v12, %v574_v18 }
 0xd1e   :  { %v583_v63 = vsel %vm580_vm1, %v582_v19, %v578_v22 }
 0xd1f   :  { %v585_v23 = vmul.f32 2.0, %v583_v63  ;;  %v587_v30 = vmul.f32 %v583_v63, %v529_v0 }
 0xd21   :  { %v871_v25 = vadd.f32 -1.0, %v585_v23 }
 0xd23   :  { %589 = vrot.lane.b32.xlu1 %v871_v25, %s1086_s4 }
 0xd95   :  { %v590_v28 = vpop.permute.xlu1 %589 }
 0xd96   :  { %v592_v29 = vmul.f32 %v590_v28, %v583_v63 }
 0xd98   :  { %594 = vrot.lane.b32.xlu2 %v592_v29, %s1087_s13  ;;  %v751_v29 = vld [vmem:[%s1365_s5 + $0x18] sm:$0xff] }
 0xd99   :  { %771 = vmatpush.msrb.mxu3 %v751_v29 }
 0xdf2   :  { %v595_v31 = vpop.permute.xlu2 %594 }
 0xdf3   :  { %v597_v32 = vadd.f32 %v595_v31, %v587_v30  ;;  %v750_v30 = vld [vmem:[%s1365_s5 + $0x10] sm:$0xff] }
 0xdf4   :  { %772 = vmatpush.msrb.mxu3 %v750_v30 }
 0xdf5   :  { %962 = vtanh.f32 %v597_v32 }
 0xdfb   :  { %v963_v33 = vpop.eup %962 }
 0xdfc   :  { %600 = vrot.lane.b32.xlu0 %v963_v33, %s1086_s4  ;;  %v749_v33 = vld [vmem:[%s1365_s5 + $0x8] sm:$0xff] }
 0xdfd   :  { %773 = vmatpush.msrb.mxu3 %v749_v33 }
 0xe6e   :  { %v601_v34 = vpop.permute.xlu0 %600 }
 0xe6f   :  { %v603_v35 = vmul.f32 %v601_v34, %v583_v63  ;;  %v748_v34 = vld [vmem:[%s1365_s5] sm:$0xff] }
 0xe70   :  { %774 = vmatpush.msrb.mxu3 %v748_v34 }
 0xe71   :  { %606 = vrot.lane.b32.xlu1 %v603_v35, %s1087_s13  ;;  %v795_v35 = vld [vmem:[#allocation7 + $0x78] sm:$0xff] }
 0xe72   :  { %800 = vmatpush.msrb.mxu1 %v795_v35 }
 0xee3   :  { %v1311_v36 = vpop.permute.xlu1 %606 }
 0xee4   :  { %872 = vmatmul.msk.f32.vlgmr.msra.gmra.mxu1 %vm202_vm8, %v1311_v36 }
 0xf61   :  { %v630_v7 = vpop.f32.mrf.mxu1 }
 0xf62   :  { %v633_v8 = vadd.f32 %v630_v7, %v192_v37  ;;  %v794_v37 = vld [vmem:[#allocation7 + $0x70] sm:$0xff]  ;;  %v793_v7 = vld [vmem:[#allocation7 + $0x68] sm:$0xff] }
 0xf63   :  { %801 = vmatpush.msrb.mxu1 %v794_v37 }
 0xf64   :  { %v873_v40 = vmul.f32 -1.442695, %v633_v8  ;;  %v792_v8 = vld [vmem:[#allocation7 + $0x60] sm:$0xff] }
 0xf65   :  { %802 = vmatpush.msrb.mxu1 %v793_v7 }
 0xf66   :  { %964 = vpow2.f32 %v873_v40  ;;  %v791_v40 = vld [vmem:[#allocation7 + $0x58] sm:$0xff] }
 0xf67   :  { %803 = vmatpush.msrb.mxu1 %v792_v8 }
 0xf69   :  { %804 = vmatpush.msrb.mxu1 %v791_v40 }
 0xf6c   :  { %v965_v41 = vpop.eup %964 }
 0xf6d   :  { %v637_v42 = vadd.f32 1.0, %v965_v41  ;;  %v790_v41 = vld [vmem:[#allocation7 + $0x50] sm:$0xff] }
 0xf6e   :  { %805 = vmatpush.msrb.mxu1 %v790_v41 }
 0xf6f   :  { %966 = vrcp.f32 %v637_v42  ;;  %v649_v46 = vand.u32 2147483648, %v637_v42  ;;  %v647_v48 = vand.u32 2147483647, %v637_v42  ;;  %vm643_vm3 = vweird.f32 %v637_v42 }
 0xf71   :  { %v650_v50 = vor.u32 1.1754944e-38, %v649_v46  ;;  %vm648_vm5 = vcmp.eq.f32.partialorder %v647_v48, 8.507059e+37  ;;  %v787_v46 = vld [vmem:[#allocation7 + $0x38] sm:$0xff] }
 0xf75   :  { %v967_v43 = vpop.eup %966 }
 0xf76   :  { %v639_v44 = vmul.f32 %v967_v43, %v637_v42  ;;  %vm644_vm2 = vweird.f32 %v967_v43  ;;  %v197_v42 = vld [vmem:[#allocation2] sm:$0xff] }
 0xf77   :  { %vm645_vm4 = vmor %vm643_vm3, %vm644_vm2  ;;  %vm332_vm11 = vcmp.gt.s32.totalorder %v197_v42, 1  ;;  %vm265_vm12 = vcmp.gt.s32.totalorder %v197_v42, 0  ;;  %vm400_vm13 = vcmp.gt.s32.totalorder %v197_v42, 2  ;;  %vm468_vm14 = vcmp.gt.s32.totalorder %v197_v42, 3 }
 0xf78   :  { %v640_v45 = vsub.f32 1.0, %v639_v44  ;;  %v788_v44 = vld [vmem:[#allocation7 + $0x40] sm:$0xff]  ;;  %v405_v48 = vsel %vm400_vm13, %v1282_v9, 0.0  ;;  %vm536_vm15 = vcmp.gt.s32.totalorder %v197_v42, 4  ;;  %vm604_vm0 = vcmp.gt.s32.totalorder %v197_v42, 5 }
 0xf79   :  { %vm672_vm1 = vcmp.gt.s32.totalorder %v197_v42, 6  ;;  %vm740_vm2 = vcmp.gt.s32.totalorder %v197_v42, 7 }
 0xf7a   :  { %v641_v47 = vmul.f32 %v967_v43, %v640_v45  ;;  %v337_v45 = vsel %vm332_vm11, %v1264_v20, 0.0 }
 0xf7c   :  { %v642_v49 = vadd.f32 %v967_v43, %v641_v47  ;;  %v270_v47 = vsel %vm265_vm12, %v1227_v61, 0.0  ;;  %v609_v61 = vsel %vm604_vm0, %v1311_v36, 0.0  ;;  %v780_v36 = vld [vmem:[#allocation7] sm:$0xff] }
 0xf7e   :  { %v646_v51 = vsel %vm645_vm4, %v967_v43, %v642_v49  ;;  %v789_v43 = vld [vmem:[#allocation7 + $0x48] sm:$0xff]  ;;  %v338_v49 = vmax.f32 %v270_v47, %v337_v45 }
 0xf7f   :  { %v651_v21 = vsel %vm648_vm5, %v650_v50, %v646_v51  ;;  %806 = vmatpush.msrb.mxu1 %v789_v43  ;;  %v786_v50 = vld [vmem:[#allocation7 + $0x30] sm:$0xff]  ;;  %v473_v51 = vsel %vm468_vm14, %v1291_v39, 0.0 }
 0xf80   :  { %v653_v52 = vmul.f32 2.0, %v651_v21  ;;  %v655_v55 = vmul.f32 %v651_v21, %v597_v32 }
 0xf81   :  { %807 = vmatpush.msrb.mxu1 %v788_v44 }
 0xf82   :  { %v874_v53 = vadd.f32 -1.0, %v653_v52  ;;  %v785_v52 = vld [vmem:[#allocation7 + $0x28] sm:$0xff] }
 0xf83   :  { %808 = vmatpush.msrb.mxu1 %v787_v46 }
 0xf84   :  { %657 = vrot.lane.b32.xlu2 %v874_v53, %s1086_s4  ;;  %v541_v53 = vsel %vm536_vm15, %v1301_v4, 0.0 }
 0xf85   :  { %809 = vmatpush.msrb.mxu1 %v786_v50 }
 0xf87   :  { %810 = vmatpush.msrb.mxu1 %v785_v52 }
 0xfde   :  { %v658_v54 = vpop.permute.xlu2 %657 }
 0xfdf   :  { %v660_v62 = vmul.f32 %v658_v54, %v651_v21  ;;  %v784_v54 = vld [vmem:[#allocation7 + $0x20] sm:$0xff] }
 0xfe0   :  { %811 = vmatpush.msrb.mxu1 %v784_v54 }
 0xfe1   :  { %662 = vrot.lane.b32.xlu0 %v660_v62, %s1087_s13  ;;  %v783_v62 = vld [vmem:[#allocation7 + $0x18] sm:$0xff] }
 0xfe2   :  { %812 = vmatpush.msrb.mxu1 %v783_v62 }
0x1053   :  { %v663_v56 = vpop.permute.xlu0 %662 }
0x1054   :  { %v665_v57 = vadd.f32 %v663_v56, %v655_v55 }
0x1056   :  { %968 = vtanh.f32 %v665_v57 }
0x105c   :  { %v969_v58 = vpop.eup %968 }
0x105d   :  { %668 = vrot.lane.b32.xlu1 %v969_v58, %s1086_s4 }
0x10cf   :  { %v669_v59 = vpop.permute.xlu1 %668 }
0x10d0   :  { %v671_v60 = vmul.f32 %v669_v59, %v651_v21  ;;  %v406_v21 = vmax.f32 %v338_v49, %v405_v48 }
0x10d2   :  { %674 = vrot.lane.b32.xlu2 %v671_v60, %s1087_s13  ;;  %v474_v20 = vmax.f32 %v406_v21, %v473_v51  ;;  %v782_v60 = vld [vmem:[#allocation7 + $0x10] sm:$0xff] }
0x10d3   :  { %813 = vmatpush.msrb.mxu1 %v782_v60 }
0x10d4   :  { %v542_v9 = vmax.f32 %v474_v20, %v541_v53 }
0x10d6   :  { %v610_v56 = vmax.f32 %v542_v9, %v609_v61 }
0x112c   :  { %v1321_v0 = vpop.permute.xlu2 %674 }
0x112d   :  { %875 = vmatmul.msk.f32.vlgmr.msrb.gmra.mxu2 %vm202_vm8, %v1321_v0  ;;  %v677_v55 = vsel %vm672_vm1, %v1321_v0, 0.0  ;;  %v926_v0 = vld [vmem:[%s1366_s6] ss:$0 sm:$0xff] }
0x112e   :  { %v678_v39 = vmax.f32 %v610_v56, %v677_v55 }
0x11b0   :  { %v698_v2 = vpop.f32.mrf.mxu2 }
0x11b1   :  { %v701_v3 = vadd.f32 %v698_v2, %v195_v1  ;;  %v781_v1 = vld [vmem:[#allocation7 + $0x8] sm:$0xff] }
0x11b2   :  { %814 = vmatpush.msrb.mxu1 %v781_v1 }
0x11b3   :  { %v876_v5 = vmul.f32 -1.442695, %v701_v3 }
0x11b4   :  { %815 = vmatpush.msrb.mxu1 %v780_v36 }
0x11b5   :  { %970 = vpow2.f32 %v876_v5 }
0x11bb   :  { %v971_v6 = vpop.eup %970 }
0x11bc   :  { %v705_v10 = vadd.f32 1.0, %v971_v6  ;;  %v927_v6 = vld [vmem:[%s1368_s8] ss:$0 sm:$0xff] }
0x11be   :  { %972 = vrcp.f32 %v705_v10  ;;  %v717_v12 = vand.u32 2147483648, %v705_v10  ;;  %v715_v14 = vand.u32 2147483647, %v705_v10  ;;  %vm711_vm7 = vweird.f32 %v705_v10 }
0x11c0   :  { %v718_v16 = vor.u32 1.1754944e-38, %v717_v12  ;;  %vm716_vm10 = vcmp.eq.f32.partialorder %v715_v14, 8.507059e+37 }
0x11c4   :  { %v973_v24 = vpop.eup %972 }
0x11c5   :  { %v707_v26 = vmul.f32 %v973_v24, %v705_v10  ;;  %vm712_vm6 = vweird.f32 %v973_v24 }
0x11c6   :  { %vm713_vm9 = vmor %vm711_vm7, %vm712_vm6 }
0x11c7   :  { %v708_v11 = vsub.f32 1.0, %v707_v26 }
0x11c9   :  { %v709_v13 = vmul.f32 %v973_v24, %v708_v11 }
0x11cb   :  { %v710_v15 = vadd.f32 %v973_v24, %v709_v13 }
0x11cd   :  { %v714_v17 = vsel %vm713_vm9, %v973_v24, %v710_v15 }
0x11ce   :  { %v719_v27 = vsel %vm716_vm10, %v718_v16, %v714_v17 }
0x11cf   :  { %v721_v38 = vmul.f32 2.0, %v719_v27  ;;  %v723_v63 = vmul.f32 %v719_v27, %v665_v57 }
0x11d1   :  { %v877_v18 = vadd.f32 -1.0, %v721_v38 }
0x11d3   :  { %725 = vrot.lane.b32.xlu0 %v877_v18, %s1086_s4 }
0x1245   :  { %v726_v19 = vpop.permute.xlu0 %725 }
0x1246   :  { %v728_v22 = vmul.f32 %v726_v19, %v719_v27 }
0x1248   :  { %730 = vrot.lane.b32.xlu1 %v728_v22, %s1087_s13 }
0x12ba   :  { %v731_v23 = vpop.permute.xlu1 %730 }
0x12bb   :  { %v733_v25 = vadd.f32 %v731_v23, %v723_v63 }
0x12bd   :  { %974 = vtanh.f32 %v733_v25 }
0x12c3   :  { %v975_v28 = vpop.eup %974 }
0x12c4   :  { %736 = vrot.lane.b32.xlu2 %v975_v28, %s1086_s4  ;;  %s1088_s4 = smov [#allocation8]  }
0x131e   :  { %v737_v31 = vpop.permute.xlu2 %736 }
0x131f   :  { %v739_v32 = vmul.f32 %v737_v31, %v719_v27 }
0x1321   :  { %742 = vrot.lane.b32.xlu0 %v739_v32, %s1087_s13  ;;  %s826_s13 = sshll.u32 %s1088_s4, 4  ;;  %s827_s13 = int_to_ptr.vmem [resolvable:$true] %s826_s13 }
0x1393   :  { %v743_v57 = vpop.permute.xlu0 %742 }
0x1394   :  { %v745_v58 = vsel %vm740_vm2, %v743_v57, 0.0 }
0x1395   :  { %v746_v59 = vmax.f32 %v678_v39, %v745_v58 }
0x1397   :  { %v747_v4 = vmax.f32 %v746_v59, 0.0 }
0x1399   :  { %878 = vmatmul.msk.f32.vlgmr.msrb.gmra.mxu3 %vm202_vm8, %v747_v4 }
0x141c   :  { %v776_v2 = vpop.f32.mrf.mxu3 }
0x141d   :  { %v777_v3 = vadd.f32 %v926_v0, %v776_v2 }
0x141f   :  { %v779_v5 = vmax.f32 %v777_v3, 0.0 }
0x1421   :  { %816 = vmatmul.f32.vlgmr.msrb.gmra.mxu1 %v779_v5 }
0x149e   :  { %v817_v10 = vpop.f32.mrf.mxu1 }
0x149f   :  { %v818_v24 = vadd.f32 %v927_v6, %v817_v10 }
0x14a1   :  { %820 = vst [vmem:[#allocation8] sm:$0xff] %v818_v24 }
0x14a2   :  { %831 = dma.vmem_to_hbm [thread:$0]  %s827_s13, 128, %s829_s16, [#allocation4]  }
0x14a3   :  { %1076 = dma.done.wait [#allocation4], 128  }
0x14a4   :  { %1077 = vsyncadd [#allocation4], 4294967168 }
0x14a5   :  { %836 = vsyncpa [#allocation3], 1 }
0x14a6   :  { %837 = vsyncpa [#allocation6], 1 }
0x14a7   :  { %838 = vsyncpa [#allocation4], 1 }

</bundles_post_ra>
